<compile_context>
chip_gen: v6e
topology: v6e:2x2x1
jax: 0.10.0
libtpu: 0.0.40
codegen_flags: <defaults>
</compile_context>

<pallas_src>
import functools

import jax
import jax.numpy as jnp
from jax.experimental import pallas as pl
from jax.experimental.pallas import tpu as pltpu


def _round_up(x, m):
    return (x + m - 1) // m * m


# ----------------------------- Pallas kernel -------------------------------

def _matmul_bn_kernel(p_ref, w_ref, shift_ref, *rest, relu_cols, total_cols,
                      tn, has_residual):
    """(tm,K)bf16 @ (K,tn)bf16 on the MXU (f32 acc) + shift (+res) (+ReLU)."""
    if has_residual:
        res_ref, o_ref = rest
    else:
        (o_ref,) = rest

    acc = jnp.dot(p_ref[...], w_ref[...], preferred_element_type=jnp.float32)
    out = acc + shift_ref[...]
    if has_residual:
        out = out + res_ref[...].astype(jnp.float32)

    if relu_cols is not None:
        relu_out = jnp.maximum(out, 0.0)
        if relu_cols >= total_cols:
            out = relu_out                       # full-width ReLU (no mask)
        else:
            # ReLU only the first `relu_cols` global columns (conv1 half of a
            # fused conv1+shortcut call); remaining columns pass through.
            col0 = pl.program_id(1) * tn
            col = col0 + jax.lax.broadcasted_iota(jnp.int32, out.shape, 1)
            out = jnp.where(col < relu_cols, relu_out, out)

    o_ref[...] = out.astype(o_ref.dtype)


# ------------------------------ glue (JAX) ---------------------------------

def _im2col(x, stride):
    """x: (N,H,W,Cin) -> patches (N*Hout*Wout, 9*Cin); tap order (kh, kw, cin)."""
    N, H, W, Cin = x.shape
    Hout = (H + 2 - 3) // stride + 1
    Wout = (W + 2 - 3) // stride + 1
    xp = jnp.pad(x, ((0, 0), (1, 1), (1, 1), (0, 0)))
    taps = []
    for kh in range(3):
        for kw in range(3):
            taps.append(xp[:, kh:kh + (Hout - 1) * stride + 1:stride,
                            kw:kw + (Wout - 1) * stride + 1:stride, :])
    patches = jnp.stack(taps, axis=3)                  # (N, Hout, Wout, 9, Cin)
    return patches.reshape(N * Hout * Wout, 9 * Cin), (N, Hout, Wout)


def fused_conv_bn(x_nhwc, w_mat_padded, shift_padded, *, stride=1, residual=None,
                  relu_cols=None, out_dtype=jnp.bfloat16, tile_m=512, tile_n=512):
    """Fused 3x3(pad=1) conv + folded-BN shift (+ residual) (+ masked ReLU).

    x_nhwc: (N,H,W,Cin).  w_mat_padded: (9*Cin, Cp) bf16-castable, BN scale
    already folded into the columns, Cp a multiple of 128 (lane-dense output).
    Returns ((M, Cp) out, (N, Hout, Wout)).
    """
    patches, (N, Hout, Wout) = _im2col(x_nhwc.astype(jnp.bfloat16), stride)
    M, K = patches.shape
    Cp = w_mat_padded.shape[1]
    assert Cp % 128 == 0, Cp

    tm = min(tile_m, _round_up(M, 8))
    Mp = pl.cdiv(M, tm) * tm
    if Mp != M:
        patches = jnp.pad(patches, ((0, Mp - M), (0, 0)))

    tn = min(tile_n, Cp)
    assert Cp % tn == 0, (Cp, tn)

    args = [patches,
            w_mat_padded.astype(jnp.bfloat16),
            shift_padded.reshape(1, Cp).astype(jnp.float32)]
    in_specs = [
        pl.BlockSpec((tm, K), lambda i, j: (i, 0)),    # im2col patches (bf16)
        pl.BlockSpec((K, tn), lambda i, j: (0, j)),    # scale-folded weights
        pl.BlockSpec((1, tn), lambda i, j: (0, j)),    # BN shift (+ folded bias)
    ]

    has_residual = residual is not None
    if has_residual:
        assert residual.shape == (M, Cp), residual.shape
        res = residual.astype(jnp.bfloat16)
        if Mp != M:
            res = jnp.pad(res, ((0, Mp - M), (0, 0)))
        args.append(res)
        in_specs.append(pl.BlockSpec((tm, tn), lambda i, j: (i, j)))

    out = pl.pallas_call(
        functools.partial(_matmul_bn_kernel, relu_cols=relu_cols,
                          total_cols=Cp, tn=tn, has_residual=has_residual),
        out_shape=jax.ShapeDtypeStruct((Mp, Cp), out_dtype),
        grid=(Mp // tm, Cp // tn),
        in_specs=in_specs,
        out_specs=pl.BlockSpec((tm, tn), lambda i, j: (i, j)),
        compiler_params=pltpu.CompilerParams(
            dimension_semantics=("parallel", "parallel"),
            vmem_limit_bytes=64 * 1024 * 1024),
    )(*args)
    return out[:M], (N, Hout, Wout)


# --------------------------- parameters / module ---------------------------

def init_basicblock_params(key, in_planes, planes, stride, eps=1e-5):
    keys = jax.random.split(key, 24)
    it = iter(keys)

    def conv_weight(cin, cout):
        # PyTorch layout (cout, cin, 3, 3); matmul layout (9*cin, cout),
        # tap-major ordering (kh, kw, cin) to match _im2col.
        w = 0.1 * jax.random.normal(next(it), (cout, cin, 3, 3), jnp.float32)
        w_mat = jnp.transpose(w, (2, 3, 1, 0)).reshape(9 * cin, cout)
        return w, w_mat

    def bn_affine(c):
        gamma = 1.0 + 0.1 * jax.random.normal(next(it), (c,), jnp.float32)
        beta = 0.1 * jax.random.normal(next(it), (c,), jnp.float32)
        running_mean = 0.1 * jax.random.normal(next(it), (c,), jnp.float32)
        running_var = 0.5 + jax.random.uniform(next(it), (c,), jnp.float32)
        scale = gamma / jnp.sqrt(running_var + eps)
        shift = beta - running_mean * scale
        return scale, shift

    p = {}
    p['w1_oihw'], p['w1_mat'] = conv_weight(in_planes, planes)
    p['scale1'], p['shift1'] = bn_affine(planes)
    p['w2_oihw'], p['w2_mat'] = conv_weight(planes, planes)
    p['scale2'], p['shift2'] = bn_affine(planes)
    if stride != 1 or in_planes != planes:
        # Shortcut: 3x3 stride conv WITH bias (nn.Conv2d default), then BN.
        p['w_s_oihw'], p['w_s_mat'] = conv_weight(in_planes, planes)
        p['bias_s'] = 0.1 * jax.random.normal(next(it), (planes,), jnp.float32)
        p['scale_s'], p['shift_s'] = bn_affine(planes)
    return p


def basicblock_forward(x_nchw, params, in_planes, planes, stride):
    """Matches Basicblock.forward (inference-mode BN). Input/output: NCHW f32."""
    x = jnp.transpose(x_nchw, (0, 2, 3, 1)).astype(jnp.float32)   # -> NHWC
    has_sc_conv = (stride != 1) or (in_planes != planes)

    # ---- conv1 (+ fused shortcut conv: identical im2col patches) ----------
    w1 = params['w1_mat'] * params['scale1'][None, :]             # fold BN scale
    sh1 = params['shift1']
    if has_sc_conv:
        ws = params['w_s_mat'] * params['scale_s'][None, :]
        shs = params['shift_s'] + params['scale_s'] * params['bias_s']  # fold bias
        w_cat = jnp.concatenate([w1, ws], axis=1)                 # (K, 2*planes)
        sh_cat = jnp.concatenate([sh1, shs], axis=0)
    else:
        w_cat, sh_cat = w1, sh1

    ncols = w_cat.shape[1]
    Cp1 = _round_up(ncols, 128)                                   # lane-dense output
    w_cat = jnp.pad(w_cat, ((0, 0), (0, Cp1 - ncols)))
    sh_cat = jnp.pad(sh_cat, (0, Cp1 - ncols))

    out1_flat, (N, Ho, Wo) = fused_conv_bn(
        x, w_cat, sh_cat, stride=stride, relu_cols=planes,
        out_dtype=jnp.bfloat16)

    out1 = out1_flat[:, :planes].reshape(N, Ho, Wo, planes)       # ReLU'd, bf16
    if has_sc_conv:
        sc_flat = out1_flat[:, planes:2 * planes]                 # no ReLU, bf16
    else:
        sc_flat = x.reshape(N * Ho * Wo, planes)                  # identity shortcut

    # ---- conv2 + residual + ReLU -------------------------------------------
    Cp2 = _round_up(planes, 128)
    w2 = jnp.pad(params['w2_mat'] * params['scale2'][None, :],
                 ((0, 0), (0, Cp2 - planes)))
    sh2 = jnp.pad(params['shift2'], (0, Cp2 - planes))
    res = jnp.pad(sc_flat.astype(jnp.bfloat16), ((0, 0), (0, Cp2 - planes)))

    out2_flat, _ = fused_conv_bn(
        out1, w2, sh2, stride=1, residual=res, relu_cols=Cp2,
        out_dtype=jnp.float32)

    out = out2_flat[:, :planes].reshape(N, Ho, Wo, planes)
    return jnp.transpose(out, (0, 3, 1, 2))                       # -> NCHW


# ----------------------------- pure-JAX reference ---------------------------

def basicblock_reference(x_nchw, params, in_planes, planes, stride):
    x = jnp.transpose(x_nchw, (0, 2, 3, 1)).astype(jnp.float32)

    def conv(inp, w_oihw, s):
        w_hwio = jnp.transpose(w_oihw, (2, 3, 1, 0))
        return jax.lax.conv_general_dilated(
            inp, w_hwio, (s, s), ((1, 1), (1, 1)),
            dimension_numbers=('NHWC', 'HWIO', 'NHWC'))

    out1 = jnp.maximum(conv(x, params['w1_oihw'], stride) * params['scale1']
                       + params['shift1'], 0.0)
    if (stride != 1) or (in_planes != planes):
        sc = ((conv(x, params['w_s_oihw'], stride) + params['bias_s'])
              * params['scale_s'] + params['shift_s'])
    else:
        sc = x
    out2 = conv(out1, params['w2_oihw'], 1) * params['scale2'] + params['shift2']
    return jnp.transpose(jnp.maximum(out2 + sc, 0.0), (0, 3, 1, 2))


# ---------------------------------- main ------------------------------------

if __name__ == "__main__":
    key = jax.random.PRNGKey(0)
    forward = jax.jit(basicblock_forward, static_argnums=(2, 3, 4))

    configs = [
        # (in_planes, planes, stride, N, H, W)
        (4, 8, 2, 2, 16, 16),   # projection (3x3 stride-2 + bias + BN) shortcut
        (8, 8, 1, 2, 16, 16),   # identity shortcut
    ]
    for in_planes, planes, stride, N, H, W in configs:
        key, kx, kp = jax.random.split(key, 3)
        x = jax.random.normal(kx, (N, in_planes, H, W), jnp.float32)
        params = init_basicblock_params(kp, in_planes, planes, stride)

        out = jax.block_until_ready(forward(x, params, in_planes, planes, stride))
        ref = jax.block_until_ready(
            basicblock_reference(x, params, in_planes, planes, stride))

        assert out.shape == (N, planes, H // stride, W // stride), out.shape
        max_err = float(jnp.max(jnp.abs(out - ref)))
        # bf16 operands / bf16 intermediate activations (f32 accumulation):
        # tolerance loosened accordingly.
        assert jnp.allclose(out, ref, atol=5e-2, rtol=5e-2), f"max_err={max_err}"

    print("KERNEL_OK")
</pallas_src>

<mosaic_0001>
module attributes {stable_mosaic.version = 11 : i64} {
  func.func @_matmul_bn_kernel(%arg0: i32, %arg1: i32, %arg2: memref<128x36xbf16, #tpu.memory_space<vmem>>, %arg3: memref<36x128xbf16, #tpu.memory_space<vmem>>, %arg4: memref<1x128xf32, #tpu.memory_space<vmem>>, %arg5: memref<128x128xbf16, #tpu.memory_space<vmem>>) attributes {dimension_semantics = [#tpu.dimension_semantics<parallel>, #tpu.dimension_semantics<parallel>], iteration_bounds = array<i64: 1, 1>, scalar_prefetch = 0 : i64, scratch_operands = 0 : i64, tpu.core_type = #tpu.core_type<tc>, window_params = [{transform_indices = @transform_0, window_bounds = array<i64: 128, 36>}, {transform_indices = @transform_1, window_bounds = array<i64: 36, 128>}, {transform_indices = @transform_2, window_bounds = array<i64: 1, 128>}, {transform_indices = @transform_3, window_bounds = array<i64: 128, 128>}]} {
    %c0 = arith.constant 0 : index
    %c0_0 = arith.constant 0 : index
    %0 = vector.load %arg2[%c0, %c0_0] : memref<128x36xbf16, #tpu.memory_space<vmem>>, vector<128x36xbf16>
    %c0_1 = arith.constant 0 : index
    %c0_2 = arith.constant 0 : index
    %1 = vector.load %arg3[%c0_1, %c0_2] : memref<36x128xbf16, #tpu.memory_space<vmem>>, vector<36x128xbf16>
    %cst = arith.constant dense<0.000000e+00> : vector<128x128xf32>
    %2 = tpu.matmul %0, %1, %cst {dimension_numbers = #tpu.dot_dimension_numbers<[1], [0], [0], [1], [0, 0, 1, 1], [], []>} : vector<128x36xbf16>, vector<36x128xbf16>, vector<128x128xf32> -> vector<128x128xf32>
    %c0_3 = arith.constant 0 : index
    %c0_4 = arith.constant 0 : index
    %3 = vector.load %arg4[%c0_3, %c0_4] : memref<1x128xf32, #tpu.memory_space<vmem>>, vector<1x128xf32>
    %4 = vector.broadcast %3 : vector<1x128xf32> to vector<128x128xf32>
    %5 = arith.addf %2, %4 : vector<128x128xf32>
    %cst_5 = arith.constant 0.000000e+00 : f32
    %6 = vector.broadcast %cst_5 : f32 to vector<128x128xf32>
    %7 = arith.maximumf %5, %6 : vector<128x128xf32>
    %c128_i32 = arith.constant 128 : i32
    %8 = arith.muli %arg1, %c128_i32 : i32
    %9 = tpu.iota {dimensions = array<i32: 1>} : vector<128x128xi32>
    %10 = vector.broadcast %8 : i32 to vector<128x128xi32>
    %11 = arith.addi %10, %9 : vector<128x128xi32>
    %c8_i32 = arith.constant 8 : i32
    %12 = vector.broadcast %c8_i32 : i32 to vector<128x128xi32>
    %13 = arith.cmpi slt, %11, %12 : vector<128x128xi32>
    %14 = arith.select %13, %7, %5 : vector<128x128xi1>, vector<128x128xf32>
    %15 = arith.truncf %14 : vector<128x128xf32> to vector<128x128xbf16>
    %c0_6 = arith.constant 0 : index
    %c0_7 = arith.constant 0 : index
    %16 = vector.load %arg5[%c0_6, %c0_7] : memref<128x128xbf16, #tpu.memory_space<vmem>>, vector<128x128xbf16>
    tpu.vector_store %arg5[%c0_6, %c0_7], %15 {strides = array<i32>} : memref<128x128xbf16, #tpu.memory_space<vmem>>, vector<128x128xbf16>,
    return
  }
  func.func @transform_0(%arg0: i32, %arg1: i32) -> (i32, i32) {
    %c0_i32 = arith.constant 0 : i32
    %c0_i32_0 = arith.constant 0 : i32
    return %arg0, %c0_i32 : i32, i32
  }
  func.func @transform_1(%arg0: i32, %arg1: i32) -> (i32, i32) {
    %c0_i32 = arith.constant 0 : i32
    %c0_i32_0 = arith.constant 0 : i32
    return %c0_i32, %arg1 : i32, i32
  }
  func.func @transform_2(%arg0: i32, %arg1: i32) -> (i32, i32) {
    %c0_i32 = arith.constant 0 : i32
    %c0_i32_0 = arith.constant 0 : i32
    return %c0_i32, %arg1 : i32, i32
  }
  func.func @transform_3(%arg0: i32, %arg1: i32) -> (i32, i32) {
    %c0_i32 = arith.constant 0 : i32
    return %arg0, %arg1 : i32, i32
  }
}

module attributes {stable_mosaic.version = 11 : i64} {
  func.func @_matmul_bn_kernel(%arg0: i32, %arg1: i32, %arg2: memref<128x72xbf16, #tpu.memory_space<vmem>>, %arg3: memref<72x128xbf16, #tpu.memory_space<vmem>>, %arg4: memref<1x128xf32, #tpu.memory_space<vmem>>, %arg5: memref<128x128xbf16, #tpu.memory_space<vmem>>, %arg6: memref<128x128xf32, #tpu.memory_space<vmem>>) attributes {dimension_semantics = [#tpu.dimension_semantics<parallel>, #tpu.dimension_semantics<parallel>], iteration_bounds = array<i64: 1, 1>, scalar_prefetch = 0 : i64, scratch_operands = 0 : i64, tpu.core_type = #tpu.core_type<tc>, window_params = [{transform_indices = @transform_0, window_bounds = array<i64: 128, 72>}, {transform_indices = @transform_1, window_bounds = array<i64: 72, 128>}, {transform_indices = @transform_2, window_bounds = array<i64: 1, 128>}, {transform_indices = @transform_3, window_bounds = array<i64: 128, 128>}, {transform_indices = @transform_4, window_bounds = array<i64: 128, 128>}]} {
    %c0 = arith.constant 0 : index
    %c0_0 = arith.constant 0 : index
    %0 = vector.load %arg2[%c0, %c0_0] : memref<128x72xbf16, #tpu.memory_space<vmem>>, vector<128x72xbf16>
    %c0_1 = arith.constant 0 : index
    %c0_2 = arith.constant 0 : index
    %1 = vector.load %arg3[%c0_1, %c0_2] : memref<72x128xbf16, #tpu.memory_space<vmem>>, vector<72x128xbf16>
    %cst = arith.constant dense<0.000000e+00> : vector<128x128xf32>
    %2 = tpu.matmul %0, %1, %cst {dimension_numbers = #tpu.dot_dimension_numbers<[1], [0], [0], [1], [0, 0, 1, 1], [], []>} : vector<128x72xbf16>, vector<72x128xbf16>, vector<128x128xf32> -> vector<128x128xf32>
    %c0_3 = arith.constant 0 : index
    %c0_4 = arith.constant 0 : index
    %3 = vector.load %arg4[%c0_3, %c0_4] : memref<1x128xf32, #tpu.memory_space<vmem>>, vector<1x128xf32>
    %4 = vector.broadcast %3 : vector<1x128xf32> to vector<128x128xf32>
    %5 = arith.addf %2, %4 : vector<128x128xf32>
    %c0_5 = arith.constant 0 : index
    %c0_6 = arith.constant 0 : index
    %6 = vector.load %arg5[%c0_5, %c0_6] : memref<128x128xbf16, #tpu.memory_space<vmem>>, vector<128x128xbf16>
    %7 = arith.extf %6 : vector<128x128xbf16> to vector<128x128xf32>
    %8 = arith.addf %5, %7 : vector<128x128xf32>
    %cst_7 = arith.constant 0.000000e+00 : f32
    %9 = vector.broadcast %cst_7 : f32 to vector<128x128xf32>
    %10 = arith.maximumf %8, %9 : vector<128x128xf32>
    %c0_8 = arith.constant 0 : index
    %c0_9 = arith.constant 0 : index
    %11 = vector.load %arg6[%c0_8, %c0_9] : memref<128x128xf32, #tpu.memory_space<vmem>>, vector<128x128xf32>
    tpu.vector_store %arg6[%c0_8, %c0_9], %10 {strides = array<i32>} : memref<128x128xf32, #tpu.memory_space<vmem>>, vector<128x128xf32>,
    return
  }
  func.func @transform_0(%arg0: i32, %arg1: i32) -> (i32, i32) {
    %c0_i32 = arith.constant 0 : i32
    %c0_i32_0 = arith.constant 0 : i32
    return %arg0, %c0_i32 : i32, i32
  }
  func.func @transform_1(%arg0: i32, %arg1: i32) -> (i32, i32) {
    %c0_i32 = arith.constant 0 : i32
    %c0_i32_0 = arith.constant 0 : i32
    return %c0_i32, %arg1 : i32, i32
  }
  func.func @transform_2(%arg0: i32, %arg1: i32) -> (i32, i32) {
    %c0_i32 = arith.constant 0 : i32
    %c0_i32_0 = arith.constant 0 : i32
    return %c0_i32, %arg1 : i32, i32
  }
  func.func @transform_3(%arg0: i32, %arg1: i32) -> (i32, i32) {
    %c0_i32 = arith.constant 0 : i32
    return %arg0, %arg1 : i32, i32
  }
  func.func @transform_4(%arg0: i32, %arg1: i32) -> (i32, i32) {
    %c0_i32 = arith.constant 0 : i32
    return %arg0, %arg1 : i32, i32
  }
}

</mosaic_0001>

<bundles_post_ra>
// kernel: basicblock_forward.2
= control target key start
LH: loop header
LB: loop body
LE: loop exit
PB: predicated region body
PF: predicated region fallthrough
CT: control target
= control target key end

     0   :  { %vm123_vm0 = vcmask 1041408   ;;  %vm98_vm1 = vcmask 293888   ;;  %v241_v12 = vlaneseq  ;;  %s638_s1 = inlined_call_operand.vmem [shape: bf16[36,128], index: 1, kind: input, shape index: {}]   ;;  %s639_s0 = inlined_call_operand.vmem [shape: bf16[128,36], index: 0, kind: input, shape index: {}]   ;;  %s640_s2 = inlined_call_operand.vmem [shape: f32[1,128], index: 2, kind: input, shape index: {}]   ;;  %s641_s3 = inlined_call_operand.vmem [shape: bf16[128,128], index: 3, kind: output, shape index: {}]  }
   0x1   :  { %v486_v0 = vld [vmem:[%s638_s1 + $0x10] ss:$0 sps:$4 sm:$0x33]   ;;  %v487_v1 = vld [vmem:[%s638_s1 + $0x8] sm:$0xff]   ;;  %v488_v3 = vld [vmem:[%s638_s1] sm:$0xff]  }
   0x2   :  { %484 = vmatprep.subr.msk.bf16.mxu0 %vm123_vm0, %v486_v0  ;;  %485 = vmatprep.subr.msk.bf16.mxu1 %vm123_vm0, %v486_v0  ;;  %v125_v2 = vsel %vm123_vm0, %v486_v0, 0  ;;  %v489_v4 = vld [vmem:[%s639_s0] sm:$0xff]   ;;  %v491_v6 = vld [vmem:[%s639_s0 + $0x8] sm:$0xff]   ;;  %v493_v8 = vld [vmem:[%s639_s0 + $0x10] sm:$0xff]   ;;  %v564_v17 = vand.u32 127, %v241_v12 }
   0x3   :  { %457 = vmatpush3.bf16.msra.mxu0 %v125_v2  ;;  %481 = vmatpush3.bf16.msra.mxu1 %v125_v2  ;;  %v490_v5 = vld [vmem:[%s639_s0 + $0x20] sm:$0xff]   ;;  %v492_v7 = vld [vmem:[%s639_s0 + $0x28] sm:$0xff]   ;;  %v494_v9 = vld [vmem:[%s639_s0 + $0x30] sm:$0xff]  }
   0x4   :  { %458 = vmatprep.subr.bf16.mxu0 %v487_v1  ;;  %479 = vmatprep.subr.bf16.mxu1 %v487_v1  ;;  %v495_v10 = vld [vmem:[%s639_s0 + $0x18] sm:$0xff]   ;;  %v561_v13 = vld [vmem:[%s640_s2] ss:$0 sm:$0xff]  ;;  %vm245_vm2 = vcmp.lt.s32.totalorder %v564_v17, 8 }
   0x5   :  { %462 = vmatprep.mubr.msk.bf16.mxu0 %vm98_vm1, %v489_v4  ;;  %470 = vmatprep.mubr.msk.bf16.mxu1 %vm98_vm1, %v490_v5  ;;  %v496_v11 = vld [vmem:[%s639_s0 + $0x38] sm:$0xff]  }
   0x7   :  { %459 = vmatpush3.bf16.msra.mxu0 %v487_v1  ;;  %482 = vmatpush3.bf16.msra.mxu1 %v487_v1 }
   0x8   :  { %460 = vmatprep.subr.bf16.mxu0 %v488_v3  ;;  %480 = vmatprep.subr.bf16.mxu1 %v488_v3 }
   0xb   :  { %461 = vmatpush3.bf16.msra.mxu0 %v488_v3  ;;  %483 = vmatpush3.bf16.msra.mxu1 %v488_v3 }
   0xe   :  { %463 = vmatmul.mubr.msk.bf16.vlgmr.msra.gmra.mxu0 %vm98_vm1, %v491_v6  ;;  %471 = vmatmul.mubr.msk.bf16.vlgmr.msra.gmra.mxu1 %vm98_vm1, %v492_v7 }
   0xf   :  { %466 = vmatprep.mubr.msk.bf16.mxu0 %vm98_vm1, %v493_v8  ;;  %474 = vmatprep.mubr.msk.bf16.mxu1 %vm98_vm1, %v494_v9 }
  0x16   :  { %467 = vmatmul.mubr.msk.bf16.gmra.mxu0 %vm98_vm1, %v495_v10  ;;  %475 = vmatmul.mubr.msk.bf16.gmra.mxu1 %vm98_vm1, %v496_v11 }
  0xce   :  { %v464_v14 = vpop.f32.mrf.mxu0  ;;  %v472_v15 = vpop.f32.mrf.mxu1 }
  0xcf   :  { %v170_v16 = vadd.f32 %v464_v14, %v561_v13  ;;  %v202_v18 = vadd.f32 %v472_v15, %v561_v13 }
  0xd0   :  { %v161_v19 = vpop.f32.mrf.mxu0  ;;  %v193_v20 = vpop.f32.mrf.mxu1 }
  0xd1   :  { %v162_v21 = vadd.f32 %v561_v13, %v161_v19  ;;  %v194_v22 = vadd.f32 %v561_v13, %v193_v20  ;;  %v226_v23 = vmax.f32 %v170_v16, 0.0  ;;  %v234_v24 = vmax.f32 %v202_v18, 0.0 }
  0xd2   :  { %v465_v25 = vpop.f32.mrf.mxu0  ;;  %v473_v26 = vpop.f32.mrf.mxu1 }
  0xd3   :  { %v224_v27 = vmax.f32 %v162_v21, 0.0  ;;  %v232_v28 = vmax.f32 %v194_v22, 0.0  ;;  %v173_v29 = vadd.f32 %v465_v25, %v561_v13  ;;  %v205_v30 = vadd.f32 %v473_v26, %v561_v13 }
  0xd4   :  { %v164_v31 = vpop.f32.mrf.mxu0  ;;  %v196_v32 = vpop.f32.mrf.mxu1  ;;  %v248_v35 = vsel %vm245_vm2, %v226_v23, %v170_v16  ;;  %v256_v36 = vsel %vm245_vm2, %v234_v24, %v202_v18 }
  0xd5   :  { %v165_v33 = vadd.f32 %v561_v13, %v164_v31  ;;  %v197_v34 = vadd.f32 %v561_v13, %v196_v32  ;;  %v227_v37 = vmax.f32 %v173_v29, 0.0  ;;  %v235_v38 = vmax.f32 %v205_v30, 0.0 }
  0xd6   :  { %v468_v39 = vpop.f32.mrf.mxu0  ;;  %v476_v40 = vpop.f32.mrf.mxu1  ;;  %v246_v45 = vsel %vm245_vm2, %v224_v27, %v162_v21  ;;  %v254_v46 = vsel %vm245_vm2, %v232_v28, %v194_v22 }
  0xd7   :  { %v225_v41 = vmax.f32 %v165_v33, 0.0  ;;  %v233_v42 = vmax.f32 %v197_v34, 0.0  ;;  %v186_v43 = vadd.f32 %v468_v39, %v561_v13  ;;  %v218_v44 = vadd.f32 %v476_v40, %v561_v13 }
  0xd8   :  { %v249_v47 = vsel %vm245_vm2, %v227_v37, %v173_v29  ;;  %v257_v48 = vsel %vm245_vm2, %v235_v38, %v205_v30  ;;  %v177_v49 = vpop.f32.mrf.mxu0  ;;  %v209_v50 = vpop.f32.mrf.mxu1 }
  0xd9   :  { %v406_v51 = vpack.c.bf16 %v249_v47, %v248_v35  ;;  %v426_v52 = vpack.c.bf16 %v257_v48, %v256_v36  ;;  %v247_v53 = vsel %vm245_vm2, %v225_v41, %v165_v33  ;;  %v255_v54 = vsel %vm245_vm2, %v233_v42, %v197_v34 }
  0xda   :  { %v401_v55 = vpack.c.bf16 %v247_v53, %v246_v45  ;;  %v421_v56 = vpack.c.bf16 %v255_v54, %v254_v46  ;;  %v230_v57 = vmax.f32 %v186_v43, 0.0  ;;  %v238_v58 = vmax.f32 %v218_v44, 0.0  ;;  %v469_v59 = vpop.f32.mrf.mxu0  ;;  %v477_v60 = vpop.f32.mrf.mxu1 }
  0xdb   :  { %438 = vst [vmem:[%s641_s3 + $0x8] sm:$0xff] %v406_v51   ;;  %442 = vst [vmem:[%s641_s3 + $0x28] sm:$0xff] %v426_v52   ;;  %v178_v61 = vadd.f32 %v561_v13, %v177_v49  ;;  %v210_v62 = vadd.f32 %v561_v13, %v209_v50  ;;  %v189_v63 = vadd.f32 %v469_v59, %v561_v13 }
  0xdc   :  { %v221_v0 = vadd.f32 %v477_v60, %v561_v13  ;;  %402 = vst [vmem:[%s641_s3] sm:$0xff] %v401_v55   ;;  %441 = vst [vmem:[%s641_s3 + $0x20] sm:$0xff] %v421_v56   ;;  %v180_v1 = vpop.f32.mrf.mxu0  ;;  %v212_v2 = vpop.f32.mrf.mxu1  ;;  %v252_v9 = vsel %vm245_vm2, %v230_v57, %v186_v43  ;;  %v260_v10 = vsel %vm245_vm2, %v238_v58, %v218_v44 }
  0xdd   :  { %v231_v3 = vmax.f32 %v189_v63, 0.0  ;;  %v228_v5 = vmax.f32 %v178_v61, 0.0  ;;  %v236_v6 = vmax.f32 %v210_v62, 0.0  ;;  %v181_v7 = vadd.f32 %v561_v13, %v180_v1 }
  0xde   :  { %v239_v4 = vmax.f32 %v221_v0, 0.0  ;;  %v213_v8 = vadd.f32 %v561_v13, %v212_v2 }
  0xdf   :  { %v253_v11 = vsel %vm245_vm2, %v231_v3, %v189_v63  ;;  %v229_v16 = vmax.f32 %v181_v7, 0.0  ;;  %v250_v19 = vsel %vm245_vm2, %v228_v5, %v178_v61  ;;  %v258_v13 = vsel %vm245_vm2, %v236_v6, %v210_v62 }
  0xe0   :  { %v261_v12 = vsel %vm245_vm2, %v239_v4, %v221_v0  ;;  %v416_v14 = vpack.c.bf16 %v253_v11, %v252_v9  ;;  %v237_v18 = vmax.f32 %v213_v8, 0.0 }
  0xe1   :  { %v436_v15 = vpack.c.bf16 %v261_v12, %v260_v10  ;;  %v251_v20 = vsel %vm245_vm2, %v229_v16, %v181_v7 }
  0xe2   :  { %440 = vst [vmem:[%s641_s3 + $0x18] sm:$0xff] %v416_v14   ;;  %v259_v21 = vsel %vm245_vm2, %v237_v18, %v213_v8  ;;  %v411_v22 = vpack.c.bf16 %v251_v20, %v250_v19 }
  0xe3   :  { %444 = vst [vmem:[%s641_s3 + $0x38] sm:$0xff] %v436_v15   ;;  %v431_v23 = vpack.c.bf16 %v259_v21, %v258_v13 }
  0xe4   :  { %439 = vst [vmem:[%s641_s3 + $0x10] sm:$0xff] %v411_v22  }
  0xe5   :  { %443 = vst [vmem:[%s641_s3 + $0x30] sm:$0xff] %v431_v23  }

// kernel: basicblock_forward.3
= control target key start
LH: loop header
LB: loop body
LE: loop exit
PB: predicated region body
PF: predicated region fallthrough
CT: control target
= control target key end

     0   :  { %vm142_vm0 = vcmask 1043456   ;;  %vm117_vm1 = vcmask 588800   ;;  %s633_s1 = inlined_call_operand.vmem [shape: bf16[72,128], index: 1, kind: input, shape index: {}]   ;;  %s634_s0 = inlined_call_operand.vmem [shape: bf16[128,72], index: 0, kind: input, shape index: {}]   ;;  %s635_s3 = inlined_call_operand.vmem [shape: bf16[128,128], index: 3, kind: input, shape index: {}]   ;;  %s636_s2 = inlined_call_operand.vmem [shape: f32[1,128], index: 2, kind: input, shape index: {}]   ;;  %s637_s4 = inlined_call_operand.vmem [shape: f32[128,128], index: 4, kind: output, shape index: {}]  }
   0x1   :  { %v439_v0 = vld [vmem:[%s633_s1 + $0x20] ss:$0 sps:$4 sm:$0xff]   ;;  %v440_v1 = vld [vmem:[%s633_s1 + $0x18] sm:$0xff]   ;;  %v441_v3 = vld [vmem:[%s633_s1 + $0x10] sm:$0xff]  }
   0x2   :  { %437 = vmatprep.subr.msk.bf16.mxu0 %vm142_vm0, %v439_v0  ;;  %438 = vmatprep.subr.msk.bf16.mxu1 %vm142_vm0, %v439_v0  ;;  %v144_v2 = vsel %vm142_vm0, %v439_v0, 0  ;;  %v444_v4 = vld [vmem:[%s634_s0] sm:$0xff]   ;;  %v442_v6 = vld [vmem:[%s633_s1 + $0x8] sm:$0xff]   ;;  %v448_v10 = vld [vmem:[%s634_s0 + $0x10] sm:$0xff]  }
   0x3   :  { %402 = vmatpush3.bf16.msra.mxu0 %v144_v2  ;;  %432 = vmatpush3.bf16.msra.mxu1 %v144_v2  ;;  %v445_v5 = vld [vmem:[%s634_s0 + $0x20] sm:$0xff]   ;;  %v446_v8 = vld [vmem:[%s634_s0 + $0x8] sm:$0xff]   ;;  %v449_v11 = vld [vmem:[%s634_s0 + $0x30] sm:$0xff]  }
   0x4   :  { %403 = vmatprep.subr.bf16.mxu0 %v440_v1  ;;  %428 = vmatprep.subr.bf16.mxu1 %v440_v1  ;;  %v443_v7 = vld [vmem:[%s633_s1] sm:$0xff]   ;;  %v447_v9 = vld [vmem:[%s634_s0 + $0x28] sm:$0xff]   ;;  %v450_v12 = vld [vmem:[%s634_s0 + $0x18] sm:$0xff]  }
   0x5   :  { %411 = vmatprep.mubr.msk.bf16.mxu0 %vm117_vm1, %v444_v4  ;;  %419 = vmatprep.mubr.msk.bf16.mxu1 %vm117_vm1, %v445_v5  ;;  %v451_v13 = vld [vmem:[%s634_s0 + $0x38] sm:$0xff]   ;;  %v381_v14 = vld [vmem:[%s635_s3 + $0x8] sm:$0xff]   ;;  %v533_v16 = vld [vmem:[%s636_s2] ss:$0 sm:$0xff] }
   0x6   :  { %v385_v15 = vld [vmem:[%s635_s3 + $0x28] sm:$0xff]   ;;  %v350_v17 = vld [vmem:[%s635_s3] sm:$0xff]   ;;  %v355_v19 = vunpack.c.l.bf16 %v381_v14  ;;  %v548_v33 = vld [vmem:[%s635_s3 + $0x18] sm:$0xff]   ;;  %v356_v36 = vunpack.c.h.bf16 %v381_v14 }
   0x7   :  { %404 = vmatpush3.bf16.msra.mxu0 %v440_v1  ;;  %433 = vmatpush3.bf16.msra.mxu1 %v440_v1  ;;  %v384_v18 = vld [vmem:[%s635_s3 + $0x20] sm:$0xff]   ;;  %v371_v20 = vunpack.c.l.bf16 %v385_v15  ;;  %v351_v25 = vunpack.c.l.bf16 %v350_v17  ;;  %v553_v34 = vld [vmem:[%s635_s3 + $0x38] sm:$0xff]   ;;  %v372_v38 = vunpack.c.h.bf16 %v385_v15  ;;  %v352_v39 = vunpack.c.h.bf16 %v350_v17  ;;  %v558_v45 = vld [vmem:[%s635_s3 + $0x10] sm:$0xff]  }
   0x8   :  { %405 = vmatprep.subr.bf16.mxu0 %v441_v3  ;;  %429 = vmatprep.subr.bf16.mxu1 %v441_v3  ;;  %v367_v26 = vunpack.c.l.bf16 %v384_v18  ;;  %v368_v40 = vunpack.c.h.bf16 %v384_v18  ;;  %v563_v46 = vld [vmem:[%s635_s3 + $0x30] sm:$0xff]   ;;  %v363_v51 = vunpack.c.l.bf16 %v548_v33  ;;  %v379_v52 = vunpack.c.l.bf16 %v553_v34 }
   0x9   :  { %v359_v61 = vunpack.c.l.bf16 %v558_v45  ;;  %v375_v62 = vunpack.c.l.bf16 %v563_v46  ;;  %v360_v18 = vunpack.c.h.bf16 %v558_v45 }
   0xb   :  { %406 = vmatpush3.bf16.msra.mxu0 %v441_v3  ;;  %434 = vmatpush3.bf16.msra.mxu1 %v441_v3 }
   0xc   :  { %407 = vmatprep.subr.bf16.mxu0 %v442_v6  ;;  %430 = vmatprep.subr.bf16.mxu1 %v442_v6 }
   0xf   :  { %408 = vmatpush3.bf16.msra.mxu0 %v442_v6  ;;  %435 = vmatpush3.bf16.msra.mxu1 %v442_v6 }
  0x10   :  { %409 = vmatprep.subr.bf16.mxu0 %v443_v7  ;;  %431 = vmatprep.subr.bf16.mxu1 %v443_v7 }
  0x13   :  { %410 = vmatpush3.bf16.msra.mxu0 %v443_v7  ;;  %436 = vmatpush3.bf16.msra.mxu1 %v443_v7  ;;  %v364_v7 = vunpack.c.h.bf16 %v548_v33 }
  0x16   :  { %412 = vmatmul.mubr.msk.bf16.vlgmr.msra.gmra.mxu0 %vm117_vm1, %v446_v8  ;;  %420 = vmatmul.mubr.msk.bf16.vlgmr.msra.gmra.mxu1 %vm117_vm1, %v447_v9  ;;  %v380_v8 = vunpack.c.h.bf16 %v553_v34 }
  0x17   :  { %415 = vmatprep.mubr.msk.bf16.mxu0 %vm117_vm1, %v448_v10  ;;  %423 = vmatprep.mubr.msk.bf16.mxu1 %vm117_vm1, %v449_v11 }
  0x1e   :  { %416 = vmatmul.mubr.msk.bf16.gmra.mxu0 %vm117_vm1, %v450_v12  ;;  %424 = vmatmul.mubr.msk.bf16.gmra.mxu1 %vm117_vm1, %v451_v13 }
  0xd6   :  { %v413_v21 = vpop.f32.mrf.mxu0  ;;  %v421_v22 = vpop.f32.mrf.mxu1 }
  0xd7   :  { %v189_v23 = vadd.f32 %v413_v21, %v533_v16  ;;  %v221_v24 = vadd.f32 %v421_v22, %v533_v16 }
  0xd8   :  { %v180_v27 = vpop.f32.mrf.mxu0  ;;  %v212_v28 = vpop.f32.mrf.mxu1 }
  0xd9   :  { %v277_v29 = vadd.f32 %v355_v19, %v189_v23  ;;  %v285_v30 = vadd.f32 %v371_v20, %v221_v24  ;;  %v181_v31 = vadd.f32 %v533_v16, %v180_v27  ;;  %v213_v32 = vadd.f32 %v533_v16, %v212_v28 }
  0xda   :  { %v414_v35 = vpop.f32.mrf.mxu0  ;;  %v422_v37 = vpop.f32.mrf.mxu1  ;;  %v376_v19 = vunpack.c.h.bf16 %v563_v46 }
  0xdb   :  { %v293_v41 = vmax.f32 %v277_v29, 0.0  ;;  %v301_v42 = vmax.f32 %v285_v30, 0.0  ;;  %v275_v43 = vadd.f32 %v351_v25, %v181_v31  ;;  %v283_v44 = vadd.f32 %v367_v26, %v213_v32 }
  0xdc   :  { %v192_v47 = vadd.f32 %v414_v35, %v533_v16  ;;  %v224_v48 = vadd.f32 %v422_v37, %v533_v16  ;;  %v183_v49 = vpop.f32.mrf.mxu0  ;;  %v215_v50 = vpop.f32.mrf.mxu1 }
  0xdd   :  { %309 = vst [vmem:[%s637_s4 + $0x10] sm:$0xff] %v293_v41  ;;  %317 = vst [vmem:[%s637_s4 + $0x50] sm:$0xff] %v301_v42  ;;  %v291_v53 = vmax.f32 %v275_v43, 0.0  ;;  %v299_v54 = vmax.f32 %v283_v44, 0.0  ;;  %v184_v55 = vadd.f32 %v533_v16, %v183_v49  ;;  %v216_v56 = vadd.f32 %v533_v16, %v215_v50 }
  0xde   :  { %v278_v57 = vadd.f32 %v356_v36, %v192_v47  ;;  %v286_v58 = vadd.f32 %v372_v38, %v224_v48  ;;  %v417_v59 = vpop.f32.mrf.mxu0  ;;  %v425_v60 = vpop.f32.mrf.mxu1 }
  0xdf   :  { %307 = vst [vmem:[%s637_s4] sm:$0xff] %v291_v53  ;;  %315 = vst [vmem:[%s637_s4 + $0x40] sm:$0xff] %v299_v54  ;;  %v276_v63 = vadd.f32 %v352_v39, %v184_v55  ;;  %v284_v0 = vadd.f32 %v368_v40, %v216_v56  ;;  %v205_v1 = vadd.f32 %v417_v59, %v533_v16 }
  0xe0   :  { %v237_v2 = vadd.f32 %v425_v60, %v533_v16  ;;  %v294_v3 = vmax.f32 %v278_v57, 0.0  ;;  %v302_v4 = vmax.f32 %v286_v58, 0.0  ;;  %v196_v5 = vpop.f32.mrf.mxu0  ;;  %v228_v6 = vpop.f32.mrf.mxu1 }
  0xe1   :  { %v292_v9 = vmax.f32 %v276_v63, 0.0  ;;  %v300_v10 = vmax.f32 %v284_v0, 0.0  ;;  %v281_v11 = vadd.f32 %v363_v51, %v205_v1  ;;  %v197_v13 = vadd.f32 %v533_v16, %v196_v5 }
  0xe2   :  { %v289_v12 = vadd.f32 %v379_v52, %v237_v2  ;;  %310 = vst [vmem:[%s637_s4 + $0x18] sm:$0xff] %v294_v3  ;;  %318 = vst [vmem:[%s637_s4 + $0x58] sm:$0xff] %v302_v4  ;;  %v229_v14 = vadd.f32 %v533_v16, %v228_v6  ;;  %v418_v15 = vpop.f32.mrf.mxu0  ;;  %v426_v17 = vpop.f32.mrf.mxu1 }
  0xe3   :  { %308 = vst [vmem:[%s637_s4 + $0x8] sm:$0xff] %v292_v9  ;;  %316 = vst [vmem:[%s637_s4 + $0x48] sm:$0xff] %v300_v10  ;;  %v297_v20 = vmax.f32 %v281_v11, 0.0  ;;  %v208_v22 = vadd.f32 %v418_v15, %v533_v16  ;;  %v240_v23 = vadd.f32 %v426_v17, %v533_v16  ;;  %v279_v24 = vadd.f32 %v359_v61, %v197_v13 }
  0xe4   :  { %v305_v21 = vmax.f32 %v289_v12, 0.0  ;;  %v287_v25 = vadd.f32 %v375_v62, %v229_v14  ;;  %v199_v26 = vpop.f32.mrf.mxu0  ;;  %v231_v27 = vpop.f32.mrf.mxu1 }
  0xe5   :  { %313 = vst [vmem:[%s637_s4 + $0x30] sm:$0xff] %v297_v20  ;;  %v282_v28 = vadd.f32 %v364_v7, %v208_v22  ;;  %v290_v29 = vadd.f32 %v380_v8, %v240_v23  ;;  %v200_v30 = vadd.f32 %v533_v16, %v199_v26  ;;  %v232_v31 = vadd.f32 %v533_v16, %v231_v27 }
  0xe6   :  { %321 = vst [vmem:[%s637_s4 + $0x70] sm:$0xff] %v305_v21  ;;  %v295_v32 = vmax.f32 %v279_v24, 0.0  ;;  %v303_v33 = vmax.f32 %v287_v25, 0.0 }
  0xe7   :  { %v298_v34 = vmax.f32 %v282_v28, 0.0  ;;  %v306_v35 = vmax.f32 %v290_v29, 0.0  ;;  %v280_v36 = vadd.f32 %v360_v18, %v200_v30  ;;  %v288_v37 = vadd.f32 %v376_v19, %v232_v31 }
  0xe8   :  { %311 = vst [vmem:[%s637_s4 + $0x20] sm:$0xff] %v295_v32  ;;  %319 = vst [vmem:[%s637_s4 + $0x60] sm:$0xff] %v303_v33 }
  0xe9   :  { %314 = vst [vmem:[%s637_s4 + $0x38] sm:$0xff] %v298_v34  ;;  %322 = vst [vmem:[%s637_s4 + $0x78] sm:$0xff] %v306_v35  ;;  %v296_v16 = vmax.f32 %v280_v36, 0.0  ;;  %v304_v38 = vmax.f32 %v288_v37, 0.0 }
  0xeb   :  { %312 = vst [vmem:[%s637_s4 + $0x28] sm:$0xff] %v296_v16  ;;  %320 = vst [vmem:[%s637_s4 + $0x68] sm:$0xff] %v304_v38 }

</bundles_post_ra>
